<compile_context>
chip_gen: v5e
topology: v5e:2x2
jax: 0.10.0
libtpu: 0.0.40
codegen_flags: <defaults>
</compile_context>

<pallas_src>
import math

import jax
import jax.numpy as jnp
from jax.experimental import pallas as pl
from jax.experimental.pallas import tpu as pltpu


def _make_mha_kernel(num_heads: int, d_k: int, has_kpm: bool, has_am: bool):
    scale = 1.0 / math.sqrt(d_k)
    min_val = float(jnp.finfo(jnp.float32).min)

    def mha_kernel(*refs):
        it = iter(refs)
        q_ref = next(it)                      # (1, tq, d_model)  bf16
        k_ref = next(it)                      # (1, T_k, d_model) bf16
        v_ref = next(it)                      # (1, T_k, d_model) bf16
        kpm_ref = next(it) if has_kpm else None   # (1, 1, T_k)  int32
        am_ref = next(it) if has_am else None     # (1, tq, T_k) int32
        wq_ref = next(it); bq_ref = next(it)  # (H, d_model, d_k) bf16 / (H, 1, d_k) f32
        wk_ref = next(it); bk_ref = next(it)
        wv_ref = next(it); bv_ref = next(it)
        wo_ref = next(it); bo_ref = next(it)  # (H, d_k, d_model) bf16 / (1, d_model) f32
        o_ref = next(it)                      # (1, tq, d_model)

        tq = q_ref.shape[1]
        d_model = q_ref.shape[2]

        qx = q_ref[0]                         # (tq, d_model)  bf16
        kx = k_ref[0]                         # (T_k, d_model) bf16
        vx = v_ref[0]                         # (T_k, d_model) bf16

        # Combined additive mask bias, computed once (hoisted out of the head
        # loop).  masked positions -> finfo(f32).min, matching masked_fill.
        bias = None
        if has_kpm:
            masked = kpm_ref[0] != 0                      # (1, T_k)
        if has_am:
            am_masked = am_ref[0] != 0                    # (tq, T_k)
            masked = am_masked if not has_kpm else (masked | am_masked)
        if has_kpm or has_am:
            bias = jnp.where(masked, jnp.float32(min_val), jnp.float32(0.0))

        out_acc = jnp.zeros((tq, d_model), jnp.float32)

        for h in range(num_heads):            # static unroll; back-to-back MXU pushes
            # Per-head projections: (tq, d_model) @ (d_model, d_k), bf16 -> f32.
            qh = jnp.dot(qx, wq_ref[h], preferred_element_type=jnp.float32) + bq_ref[h]
            kh = jnp.dot(kx, wk_ref[h], preferred_element_type=jnp.float32) + bk_ref[h]
            vh = jnp.dot(vx, wv_ref[h], preferred_element_type=jnp.float32) + bv_ref[h]
            qh = qh * scale                    # fold 1/sqrt(d_k) into q (cheaper than scaling scores)

            # scores: (tq, d_k) x (T_k, d_k)^T -> (tq, T_k), f32 accumulation.
            s = jax.lax.dot_general(
                qh.astype(jnp.bfloat16), kh.astype(jnp.bfloat16),
                (((1,), (1,)), ((), ())),
                preferred_element_type=jnp.float32)
            if bias is not None:
                s = s + bias

            # explicit softmax; divide goes to the EUP via approx reciprocal and
            # is applied to the small (tq, d_k) context instead of (tq, T_k).
            m = jnp.max(s, axis=-1, keepdims=True)
            e = jnp.exp(s - m)
            denom = jnp.sum(e, axis=-1, keepdims=True)
            inv = pl.reciprocal(denom, approx=True)        # (tq, 1)

            ctx_h = jnp.dot(e.astype(jnp.bfloat16), vh.astype(jnp.bfloat16),
                            preferred_element_type=jnp.float32) * inv   # (tq, d_k)

            # Fold head-concat into the output projection: accumulate
            # ctx_h @ W_o[h*d_k:(h+1)*d_k, :] (pre-split in the wrapper).
            out_acc = out_acc + jnp.dot(ctx_h.astype(jnp.bfloat16), wo_ref[h],
                                        preferred_element_type=jnp.float32)

        o_ref[0] = (out_acc + bo_ref[...]).astype(o_ref.dtype)

    return mha_kernel


def _pick_q_tile(T_q: int) -> int:
    for cand in (512, 256, 128):
        if T_q % cand == 0:
            return cand
    return T_q


def multi_head_attention(query, key, value, params, num_heads,
                         key_padding_mask=None, attention_mask=None):
    """query/key/value: (B, T, d_model) float32.
    params: W_q/W_k/W_v/W_o of shape (d_model, d_model) in PyTorch (out, in)
    convention; biases b_q/b_k/b_v/b_o of shape (d_model,).
    key_padding_mask: optional (B, T_k) int. attention_mask: optional
    (1, T_q, T_k) or (B, T_q, T_k) int. Non-zero positions are masked out."""
    B, T_q, d_model = query.shape
    T_k = key.shape[1]
    d_k = d_model // num_heads
    assert d_k * num_heads == d_model

    has_kpm = key_padding_mask is not None
    has_am = attention_mask is not None
    tq = _pick_q_tile(T_q)

    # bf16 matmul operands (MXU-native on v5e/v6e/v7x); f32 accumulation in-kernel.
    q_in = query.astype(jnp.bfloat16)
    k_in = key.astype(jnp.bfloat16)
    v_in = value.astype(jnp.bfloat16)

    # Pre-split weights per head (host/XLA side, free):
    #   W_{q,k,v}: (out, in) -> (in, out) -> (H, in=d_model, d_k)
    #   W_o      : (out, in) -> (in, out) -> (H, d_k, d_model)
    def split_in(W):
        return jnp.transpose(W.T.reshape(d_model, num_heads, d_k), (1, 0, 2)).astype(jnp.bfloat16)

    wq = split_in(params["W_q"])
    wk = split_in(params["W_k"])
    wv = split_in(params["W_v"])
    wo = params["W_o"].T.reshape(num_heads, d_k, d_model).astype(jnp.bfloat16)

    def split_b(b):
        return b.reshape(num_heads, 1, d_k).astype(jnp.float32)

    bq = split_b(params["b_q"])
    bk = split_b(params["b_k"])
    bv = split_b(params["b_v"])
    bo = params["b_o"].reshape(1, d_model).astype(jnp.float32)

    args = [q_in, k_in, v_in]
    in_specs = [
        pl.BlockSpec((1, tq, d_model), lambda b, qi: (b, qi, 0)),   # query tile
        pl.BlockSpec((1, T_k, d_model), lambda b, qi: (b, 0, 0)),   # full key slab
        pl.BlockSpec((1, T_k, d_model), lambda b, qi: (b, 0, 0)),   # full value slab
    ]

    if has_kpm:
        kpm = key_padding_mask.astype(jnp.int32).reshape(B, 1, T_k)
        args.append(kpm)
        in_specs.append(pl.BlockSpec((1, 1, T_k), lambda b, qi: (b, 0, 0)))

    if has_am:
        am = attention_mask.astype(jnp.int32)
        if am.ndim == 2:
            am = am[None]
        # Keep the mask at its given batch extent (1 or B) - never broadcast
        # materialize a (B, T_q, T_k) tensor; the index_map handles it.
        if am.shape[0] == 1:
            am_spec = pl.BlockSpec((1, tq, T_k), lambda b, qi: (0, qi, 0))
        else:
            am_spec = pl.BlockSpec((1, tq, T_k), lambda b, qi: (b, qi, 0))
        args.append(am)
        in_specs.append(am_spec)

    def const_spec(shape):
        return pl.BlockSpec(shape, lambda b, qi, _s=shape: (0,) * len(_s))

    args += [wq, bq, wk, bk, wv, bv, wo, bo]
    in_specs += [
        const_spec((num_heads, d_model, d_k)), const_spec((num_heads, 1, d_k)),   # W_q, b_q
        const_spec((num_heads, d_model, d_k)), const_spec((num_heads, 1, d_k)),   # W_k, b_k
        const_spec((num_heads, d_model, d_k)), const_spec((num_heads, 1, d_k)),   # W_v, b_v
        const_spec((num_heads, d_k, d_model)), const_spec((1, d_model)),          # W_o, b_o
    ]

    kernel = _make_mha_kernel(num_heads, d_k, has_kpm, has_am)

    out = pl.pallas_call(
        kernel,
        out_shape=jax.ShapeDtypeStruct((B, T_q, d_model), query.dtype),
        grid_spec=pltpu.PrefetchScalarGridSpec(
            num_scalar_prefetch=0,
            grid=(B, T_q // tq),
            in_specs=in_specs,
            out_specs=pl.BlockSpec((1, tq, d_model), lambda b, qi: (b, qi, 0)),
        ),
        compiler_params=pltpu.CompilerParams(
            dimension_semantics=("parallel", "parallel"),
            vmem_limit_bytes=64 * 1024 * 1024,
        ),
    )(*args)
    return out


def _reference_mha(query, key, value, params, num_heads,
                   key_padding_mask=None, attention_mask=None):
    """Pure-JAX f32 reference mirroring the PyTorch module exactly."""
    B, T_q, d_model = query.shape
    T_k = key.shape[1]
    d_k = d_model // num_heads
    min_val = jnp.finfo(query.dtype).min

    def lin(x, W, b):
        return x @ W.T + b

    q = lin(query, params["W_q"], params["b_q"]).reshape(B, T_q, num_heads, d_k).transpose(0, 2, 1, 3)
    k = lin(key, params["W_k"], params["b_k"]).reshape(B, T_k, num_heads, d_k).transpose(0, 2, 1, 3)
    v = lin(value, params["W_v"], params["b_v"]).reshape(B, T_k, num_heads, d_k).transpose(0, 2, 1, 3)

    score = jnp.einsum("bhqd,bhkd->bhqk", q, k) / math.sqrt(d_k)
    if key_padding_mask is not None:
        m = key_padding_mask[:, None, None, :]
        score = jnp.where(m != 0, min_val, score)
    if attention_mask is not None:
        m = jnp.broadcast_to(attention_mask[:, None, :, :], (B, num_heads, T_q, T_k))
        score = jnp.where(m != 0, min_val, score)
    attn = jax.nn.softmax(score, axis=-1)
    ctx = jnp.einsum("bhqk,bhkd->bhqd", attn, v)
    ctx = ctx.transpose(0, 2, 1, 3).reshape(B, T_q, d_model)
    return lin(ctx, params["W_o"], params["b_o"])


if __name__ == "__main__":
    B, T_q, T_k, d_model, num_heads = 2, 8, 8, 32, 4

    key0 = jax.random.PRNGKey(0)
    keys = jax.random.split(key0, 12)

    # PyTorch nn.Linear-style deterministic init: U(-1/sqrt(fan_in), 1/sqrt(fan_in))
    bound = 1.0 / math.sqrt(d_model)
    params = {
        "W_q": jax.random.uniform(keys[0], (d_model, d_model), jnp.float32, -bound, bound),
        "b_q": jax.random.uniform(keys[1], (d_model,), jnp.float32, -bound, bound),
        "W_k": jax.random.uniform(keys[2], (d_model, d_model), jnp.float32, -bound, bound),
        "b_k": jax.random.uniform(keys[3], (d_model,), jnp.float32, -bound, bound),
        "W_v": jax.random.uniform(keys[4], (d_model, d_model), jnp.float32, -bound, bound),
        "b_v": jax.random.uniform(keys[5], (d_model,), jnp.float32, -bound, bound),
        "W_o": jax.random.uniform(keys[6], (d_model, d_model), jnp.float32, -bound, bound),
        "b_o": jax.random.uniform(keys[7], (d_model,), jnp.float32, -bound, bound),
    }

    query = jax.random.normal(keys[8], (B, T_q, d_model), jnp.float32)
    key_in = jax.random.normal(keys[9], (B, T_k, d_model), jnp.float32)
    value = jax.random.normal(keys[10], (B, T_k, d_model), jnp.float32)

    # key_padding_mask: last 2 positions of batch element 1 are padded.
    key_padding_mask = jnp.zeros((B, T_k), jnp.int32).at[1, -2:].set(1)
    # causal attention_mask (1, T_q, T_k): non-zero above diagonal = disallowed.
    attention_mask = (jnp.triu(jnp.ones((T_q, T_k), jnp.int32), k=1))[None, :, :]

    # Masked case.
    out = multi_head_attention(query, key_in, value, params, num_heads,
                               key_padding_mask=key_padding_mask,
                               attention_mask=attention_mask)
    out = jax.block_until_ready(out)
    ref = _reference_mha(query, key_in, value, params, num_heads,
                         key_padding_mask=key_padding_mask,
                         attention_mask=attention_mask)
    assert out.shape == (B, T_q, d_model)
    # bf16 matmul operands vs f32 reference -> loosened tolerance.
    assert jnp.allclose(out, ref, atol=3e-2, rtol=3e-2), "mismatch vs reference (masked)"

    # No-mask specialization path.
    out2 = multi_head_attention(query, key_in, value, params, num_heads)
    out2 = jax.block_until_ready(out2)
    ref2 = _reference_mha(query, key_in, value, params, num_heads)
    assert jnp.allclose(out2, ref2, atol=3e-2, rtol=3e-2), "mismatch vs reference (unmasked)"

    print("KERNEL_OK")
</pallas_src>

<mosaic_0001>
module attributes {stable_mosaic.version = 11 : i64} {
  func.func @mha_kernel(%arg0: i32, %arg1: i32, %arg2: memref<1x8x32xbf16, #tpu.memory_space<vmem>>, %arg3: memref<1x8x32xbf16, #tpu.memory_space<vmem>>, %arg4: memref<1x8x32xbf16, #tpu.memory_space<vmem>>, %arg5: memref<1x1x8xi32, #tpu.memory_space<vmem>>, %arg6: memref<1x8x8xi32, #tpu.memory_space<vmem>>, %arg7: memref<4x32x8xbf16, #tpu.memory_space<vmem>>, %arg8: memref<4x1x8xf32, #tpu.memory_space<vmem>>, %arg9: memref<4x32x8xbf16, #tpu.memory_space<vmem>>, %arg10: memref<4x1x8xf32, #tpu.memory_space<vmem>>, %arg11: memref<4x32x8xbf16, #tpu.memory_space<vmem>>, %arg12: memref<4x1x8xf32, #tpu.memory_space<vmem>>, %arg13: memref<4x8x32xbf16, #tpu.memory_space<vmem>>, %arg14: memref<1x32xf32, #tpu.memory_space<vmem>>, %arg15: memref<1x8x32xf32, #tpu.memory_space<vmem>>) attributes {dimension_semantics = [#tpu.dimension_semantics<parallel>, #tpu.dimension_semantics<parallel>], iteration_bounds = array<i64: 2, 1>, scalar_prefetch = 0 : i64, scratch_operands = 0 : i64, tpu.core_type = #tpu.core_type<tc>, window_params = [{transform_indices = @transform_0, window_bounds = array<i64: 1, 8, 32>}, {transform_indices = @transform_1, window_bounds = array<i64: 1, 8, 32>}, {transform_indices = @transform_2, window_bounds = array<i64: 1, 8, 32>}, {transform_indices = @transform_3, window_bounds = array<i64: 1, 1, 8>}, {transform_indices = @transform_4, window_bounds = array<i64: 1, 8, 8>}, {pipeline_mode = #tpu.pipeline_mode<synchronous>, transform_indices = @transform_5, window_bounds = array<i64: 4, 32, 8>}, {pipeline_mode = #tpu.pipeline_mode<synchronous>, transform_indices = @transform_6, window_bounds = array<i64: 4, 1, 8>}, {pipeline_mode = #tpu.pipeline_mode<synchronous>, transform_indices = @transform_7, window_bounds = array<i64: 4, 32, 8>}, {pipeline_mode = #tpu.pipeline_mode<synchronous>, transform_indices = @transform_8, window_bounds = array<i64: 4, 1, 8>}, {pipeline_mode = #tpu.pipeline_mode<synchronous>, transform_indices = @transform_9, window_bounds = array<i64: 4, 32, 8>}, {pipeline_mode = #tpu.pipeline_mode<synchronous>, transform_indices = @transform_10, window_bounds = array<i64: 4, 1, 8>}, {pipeline_mode = #tpu.pipeline_mode<synchronous>, transform_indices = @transform_11, window_bounds = array<i64: 4, 8, 32>}, {pipeline_mode = #tpu.pipeline_mode<synchronous>, transform_indices = @transform_12, window_bounds = array<i64: 1, 32>}, {transform_indices = @transform_13, window_bounds = array<i64: 1, 8, 32>}]} {
    %c0 = arith.constant 0 : index
    %c0_0 = arith.constant 0 : index
    %c0_1 = arith.constant 0 : index
    %0 = vector.load %arg2[%c0, %c0_0, %c0_1] : memref<1x8x32xbf16, #tpu.memory_space<vmem>>, vector<1x8x32xbf16>
    %1 = vector.shape_cast %0 : vector<1x8x32xbf16> to vector<8x32xbf16>
    %c0_2 = arith.constant 0 : index
    %c0_3 = arith.constant 0 : index
    %c0_4 = arith.constant 0 : index
    %2 = vector.load %arg3[%c0_2, %c0_3, %c0_4] : memref<1x8x32xbf16, #tpu.memory_space<vmem>>, vector<1x8x32xbf16>
    %3 = vector.shape_cast %2 : vector<1x8x32xbf16> to vector<8x32xbf16>
    %c0_5 = arith.constant 0 : index
    %c0_6 = arith.constant 0 : index
    %c0_7 = arith.constant 0 : index
    %4 = vector.load %arg4[%c0_5, %c0_6, %c0_7] : memref<1x8x32xbf16, #tpu.memory_space<vmem>>, vector<1x8x32xbf16>
    %5 = vector.shape_cast %4 : vector<1x8x32xbf16> to vector<8x32xbf16>
    %c0_8 = arith.constant 0 : index
    %c0_9 = arith.constant 0 : index
    %c0_10 = arith.constant 0 : index
    %6 = vector.load %arg5[%c0_8, %c0_9, %c0_10] : memref<1x1x8xi32, #tpu.memory_space<vmem>>, vector<1x1x8xi32>
    %7 = vector.shape_cast %6 : vector<1x1x8xi32> to vector<1x8xi32>
    %c0_i32 = arith.constant 0 : i32
    %8 = vector.broadcast %c0_i32 : i32 to vector<1x8xi32>
    %9 = arith.cmpi ne, %7, %8 : vector<1x8xi32>
    %c0_11 = arith.constant 0 : index
    %c0_12 = arith.constant 0 : index
    %c0_13 = arith.constant 0 : index
    %10 = vector.load %arg6[%c0_11, %c0_12, %c0_13] : memref<1x8x8xi32, #tpu.memory_space<vmem>>, vector<1x8x8xi32>
    %11 = vector.shape_cast %10 : vector<1x8x8xi32> to vector<8x8xi32>
    %c0_i32_14 = arith.constant 0 : i32
    %12 = vector.broadcast %c0_i32_14 : i32 to vector<8x8xi32>
    %13 = arith.cmpi ne, %11, %12 : vector<8x8xi32>
    %14 = vector.broadcast %9 : vector<1x8xi1> to vector<8x8xi1>
    %15 = arith.ori %14, %13 : vector<8x8xi1>
    %cst = arith.constant -3.40282347E+38 : f32
    %cst_15 = arith.constant 0.000000e+00 : f32
    %16 = vector.broadcast %cst : f32 to vector<8x8xf32>
    %17 = vector.broadcast %cst_15 : f32 to vector<8x8xf32>
    %18 = arith.select %15, %16, %17 : vector<8x8xi1>, vector<8x8xf32>
    %cst_16 = arith.constant 0.000000e+00 : f32
    %19 = vector.broadcast %cst_16 : f32 to vector<8x32xf32>
    %c0_17 = arith.constant 0 : index
    %c0_18 = arith.constant 0 : index
    %c0_19 = arith.constant 0 : index
    %20 = vector.load %arg7[%c0_17, %c0_18, %c0_19] : memref<4x32x8xbf16, #tpu.memory_space<vmem>>, vector<1x32x8xbf16>
    %21 = vector.shape_cast %20 : vector<1x32x8xbf16> to vector<32x8xbf16>
    %cst_20 = arith.constant dense<0.000000e+00> : vector<8x8xf32>
    %22 = tpu.matmul %1, %21, %cst_20 {dimension_numbers = #tpu.dot_dimension_numbers<[1], [0], [0], [1], [0, 0, 1, 1], [], []>} : vector<8x32xbf16>, vector<32x8xbf16>, vector<8x8xf32> -> vector<8x8xf32>
    %c0_21 = arith.constant 0 : index
    %c0_22 = arith.constant 0 : index
    %c0_23 = arith.constant 0 : index
    %23 = vector.load %arg8[%c0_21, %c0_22, %c0_23] : memref<4x1x8xf32, #tpu.memory_space<vmem>>, vector<1x1x8xf32>
    %24 = vector.shape_cast %23 : vector<1x1x8xf32> to vector<1x8xf32>
    %25 = vector.broadcast %24 : vector<1x8xf32> to vector<8x8xf32>
    %26 = arith.addf %22, %25 : vector<8x8xf32>
    %c0_24 = arith.constant 0 : index
    %c0_25 = arith.constant 0 : index
    %c0_26 = arith.constant 0 : index
    %27 = vector.load %arg9[%c0_24, %c0_25, %c0_26] : memref<4x32x8xbf16, #tpu.memory_space<vmem>>, vector<1x32x8xbf16>
    %28 = vector.shape_cast %27 : vector<1x32x8xbf16> to vector<32x8xbf16>
    %cst_27 = arith.constant dense<0.000000e+00> : vector<8x8xf32>
    %29 = tpu.matmul %3, %28, %cst_27 {dimension_numbers = #tpu.dot_dimension_numbers<[1], [0], [0], [1], [0, 0, 1, 1], [], []>} : vector<8x32xbf16>, vector<32x8xbf16>, vector<8x8xf32> -> vector<8x8xf32>
    %c0_28 = arith.constant 0 : index
    %c0_29 = arith.constant 0 : index
    %c0_30 = arith.constant 0 : index
    %30 = vector.load %arg10[%c0_28, %c0_29, %c0_30] : memref<4x1x8xf32, #tpu.memory_space<vmem>>, vector<1x1x8xf32>
    %31 = vector.shape_cast %30 : vector<1x1x8xf32> to vector<1x8xf32>
    %32 = vector.broadcast %31 : vector<1x8xf32> to vector<8x8xf32>
    %33 = arith.addf %29, %32 : vector<8x8xf32>
    %c0_31 = arith.constant 0 : index
    %c0_32 = arith.constant 0 : index
    %c0_33 = arith.constant 0 : index
    %34 = vector.load %arg11[%c0_31, %c0_32, %c0_33] : memref<4x32x8xbf16, #tpu.memory_space<vmem>>, vector<1x32x8xbf16>
    %35 = vector.shape_cast %34 : vector<1x32x8xbf16> to vector<32x8xbf16>
    %cst_34 = arith.constant dense<0.000000e+00> : vector<8x8xf32>
    %36 = tpu.matmul %5, %35, %cst_34 {dimension_numbers = #tpu.dot_dimension_numbers<[1], [0], [0], [1], [0, 0, 1, 1], [], []>} : vector<8x32xbf16>, vector<32x8xbf16>, vector<8x8xf32> -> vector<8x8xf32>
    %c0_35 = arith.constant 0 : index
    %c0_36 = arith.constant 0 : index
    %c0_37 = arith.constant 0 : index
    %37 = vector.load %arg12[%c0_35, %c0_36, %c0_37] : memref<4x1x8xf32, #tpu.memory_space<vmem>>, vector<1x1x8xf32>
    %38 = vector.shape_cast %37 : vector<1x1x8xf32> to vector<1x8xf32>
    %39 = vector.broadcast %38 : vector<1x8xf32> to vector<8x8xf32>
    %40 = arith.addf %36, %39 : vector<8x8xf32>
    %cst_38 = arith.constant 0.353553385 : f32
    %41 = vector.broadcast %cst_38 : f32 to vector<8x8xf32>
    %42 = arith.mulf %26, %41 : vector<8x8xf32>
    %43 = arith.truncf %42 : vector<8x8xf32> to vector<8x8xbf16>
    %44 = arith.truncf %33 : vector<8x8xf32> to vector<8x8xbf16>
    %cst_39 = arith.constant dense<0.000000e+00> : vector<8x8xf32>
    %45 = tpu.matmul %43, %44, %cst_39 {dimension_numbers = #tpu.dot_dimension_numbers<[1], [1], [0], [0], [0, 0, 1, 0], [], []>} : vector<8x8xbf16>, vector<8x8xbf16>, vector<8x8xf32> -> vector<8x8xf32>
    %46 = arith.addf %45, %18 : vector<8x8xf32>
    %cst_40 = arith.constant dense<0xFF800000> : vector<8xf32>
    %47 = vector.multi_reduction <maximumf>, %46, %cst_40 [1] : vector<8x8xf32> to vector<8xf32>
    %48 = vector.shape_cast %47 : vector<8xf32> to vector<8x1xf32>
    %49 = vector.broadcast %48 : vector<8x1xf32> to vector<8x8xf32>
    %50 = arith.subf %46, %49 : vector<8x8xf32>
    %51 = math.exp %50 : vector<8x8xf32>
    %cst_41 = arith.constant dense<0.000000e+00> : vector<8xf32>
    %52 = vector.multi_reduction <add>, %51, %cst_41 [1] : vector<8x8xf32> to vector<8xf32>
    %53 = vector.shape_cast %52 : vector<8xf32> to vector<8x1xf32>
    %54 = tpu.reciprocal %53 {approx = true} : vector<8x1xf32> -> vector<8x1xf32>
    %55 = arith.truncf %51 : vector<8x8xf32> to vector<8x8xbf16>
    %56 = arith.truncf %40 : vector<8x8xf32> to vector<8x8xbf16>
    %cst_42 = arith.constant dense<0.000000e+00> : vector<8x8xf32>
    %57 = tpu.matmul %55, %56, %cst_42 {dimension_numbers = #tpu.dot_dimension_numbers<[1], [0], [0], [1], [0, 0, 1, 1], [], []>} : vector<8x8xbf16>, vector<8x8xbf16>, vector<8x8xf32> -> vector<8x8xf32>
    %58 = vector.broadcast %54 : vector<8x1xf32> to vector<8x8xf32>
    %59 = arith.mulf %57, %58 : vector<8x8xf32>
    %60 = arith.truncf %59 : vector<8x8xf32> to vector<8x8xbf16>
    %c0_43 = arith.constant 0 : index
    %c0_44 = arith.constant 0 : index
    %c0_45 = arith.constant 0 : index
    %61 = vector.load %arg13[%c0_43, %c0_44, %c0_45] : memref<4x8x32xbf16, #tpu.memory_space<vmem>>, vector<1x8x32xbf16>
    %62 = vector.shape_cast %61 : vector<1x8x32xbf16> to vector<8x32xbf16>
    %cst_46 = arith.constant dense<0.000000e+00> : vector<8x32xf32>
    %63 = tpu.matmul %60, %62, %cst_46 {dimension_numbers = #tpu.dot_dimension_numbers<[1], [0], [0], [1], [0, 0, 1, 1], [], []>} : vector<8x8xbf16>, vector<8x32xbf16>, vector<8x32xf32> -> vector<8x32xf32>
    %64 = arith.addf %19, %63 : vector<8x32xf32>
    %c1 = arith.constant 1 : index
    %c0_47 = arith.constant 0 : index
    %c0_48 = arith.constant 0 : index
    %65 = vector.load %arg7[%c1, %c0_47, %c0_48] : memref<4x32x8xbf16, #tpu.memory_space<vmem>>, vector<1x32x8xbf16>
    %66 = vector.shape_cast %65 : vector<1x32x8xbf16> to vector<32x8xbf16>
    %cst_49 = arith.constant dense<0.000000e+00> : vector<8x8xf32>
    %67 = tpu.matmul %1, %66, %cst_49 {dimension_numbers = #tpu.dot_dimension_numbers<[1], [0], [0], [1], [0, 0, 1, 1], [], []>} : vector<8x32xbf16>, vector<32x8xbf16>, vector<8x8xf32> -> vector<8x8xf32>
    %c1_50 = arith.constant 1 : index
    %c0_51 = arith.constant 0 : index
    %c0_52 = arith.constant 0 : index
    %68 = vector.load %arg8[%c1_50, %c0_51, %c0_52] : memref<4x1x8xf32, #tpu.memory_space<vmem>>, vector<1x1x8xf32>
    %69 = vector.shape_cast %68 : vector<1x1x8xf32> to vector<1x8xf32>
    %70 = vector.broadcast %69 : vector<1x8xf32> to vector<8x8xf32>
    %71 = arith.addf %67, %70 : vector<8x8xf32>
    %c1_53 = arith.constant 1 : index
    %c0_54 = arith.constant 0 : index
    %c0_55 = arith.constant 0 : index
    %72 = vector.load %arg9[%c1_53, %c0_54, %c0_55] : memref<4x32x8xbf16, #tpu.memory_space<vmem>>, vector<1x32x8xbf16>
    %73 = vector.shape_cast %72 : vector<1x32x8xbf16> to vector<32x8xbf16>
    %cst_56 = arith.constant dense<0.000000e+00> : vector<8x8xf32>
    %74 = tpu.matmul %3, %73, %cst_56 {dimension_numbers = #tpu.dot_dimension_numbers<[1], [0], [0], [1], [0, 0, 1, 1], [], []>} : vector<8x32xbf16>, vector<32x8xbf16>, vector<8x8xf32> -> vector<8x8xf32>
    %c1_57 = arith.constant 1 : index
    %c0_58 = arith.constant 0 : index
    %c0_59 = arith.constant 0 : index
    %75 = vector.load %arg10[%c1_57, %c0_58, %c0_59] : memref<4x1x8xf32, #tpu.memory_space<vmem>>, vector<1x1x8xf32>
    %76 = vector.shape_cast %75 : vector<1x1x8xf32> to vector<1x8xf32>
    %77 = vector.broadcast %76 : vector<1x8xf32> to vector<8x8xf32>
    %78 = arith.addf %74, %77 : vector<8x8xf32>
    %c1_60 = arith.constant 1 : index
    %c0_61 = arith.constant 0 : index
    %c0_62 = arith.constant 0 : index
    %79 = vector.load %arg11[%c1_60, %c0_61, %c0_62] : memref<4x32x8xbf16, #tpu.memory_space<vmem>>, vector<1x32x8xbf16>
    %80 = vector.shape_cast %79 : vector<1x32x8xbf16> to vector<32x8xbf16>
    %cst_63 = arith.constant dense<0.000000e+00> : vector<8x8xf32>
    %81 = tpu.matmul %5, %80, %cst_63 {dimension_numbers = #tpu.dot_dimension_numbers<[1], [0], [0], [1], [0, 0, 1, 1], [], []>} : vector<8x32xbf16>, vector<32x8xbf16>, vector<8x8xf32> -> vector<8x8xf32>
    %c1_64 = arith.constant 1 : index
    %c0_65 = arith.constant 0 : index
    %c0_66 = arith.constant 0 : index
    %82 = vector.load %arg12[%c1_64, %c0_65, %c0_66] : memref<4x1x8xf32, #tpu.memory_space<vmem>>, vector<1x1x8xf32>
    %83 = vector.shape_cast %82 : vector<1x1x8xf32> to vector<1x8xf32>
    %84 = vector.broadcast %83 : vector<1x8xf32> to vector<8x8xf32>
    %85 = arith.addf %81, %84 : vector<8x8xf32>
    %cst_67 = arith.constant 0.353553385 : f32
    %86 = vector.broadcast %cst_67 : f32 to vector<8x8xf32>
    %87 = arith.mulf %71, %86 : vector<8x8xf32>
    %88 = arith.truncf %87 : vector<8x8xf32> to vector<8x8xbf16>
    %89 = arith.truncf %78 : vector<8x8xf32> to vector<8x8xbf16>
    %cst_68 = arith.constant dense<0.000000e+00> : vector<8x8xf32>
    %90 = tpu.matmul %88, %89, %cst_68 {dimension_numbers = #tpu.dot_dimension_numbers<[1], [1], [0], [0], [0, 0, 1, 0], [], []>} : vector<8x8xbf16>, vector<8x8xbf16>, vector<8x8xf32> -> vector<8x8xf32>
    %91 = arith.addf %90, %18 : vector<8x8xf32>
    %cst_69 = arith.constant dense<0xFF800000> : vector<8xf32>
    %92 = vector.multi_reduction <maximumf>, %91, %cst_69 [1] : vector<8x8xf32> to vector<8xf32>
    %93 = vector.shape_cast %92 : vector<8xf32> to vector<8x1xf32>
    %94 = vector.broadcast %93 : vector<8x1xf32> to vector<8x8xf32>
    %95 = arith.subf %91, %94 : vector<8x8xf32>
    %96 = math.exp %95 : vector<8x8xf32>
    %cst_70 = arith.constant dense<0.000000e+00> : vector<8xf32>
    %97 = vector.multi_reduction <add>, %96, %cst_70 [1] : vector<8x8xf32> to vector<8xf32>
    %98 = vector.shape_cast %97 : vector<8xf32> to vector<8x1xf32>
    %99 = tpu.reciprocal %98 {approx = true} : vector<8x1xf32> -> vector<8x1xf32>
    %100 = arith.truncf %96 : vector<8x8xf32> to vector<8x8xbf16>
    %101 = arith.truncf %85 : vector<8x8xf32> to vector<8x8xbf16>
    %cst_71 = arith.constant dense<0.000000e+00> : vector<8x8xf32>
    %102 = tpu.matmul %100, %101, %cst_71 {dimension_numbers = #tpu.dot_dimension_numbers<[1], [0], [0], [1], [0, 0, 1, 1], [], []>} : vector<8x8xbf16>, vector<8x8xbf16>, vector<8x8xf32> -> vector<8x8xf32>
    %103 = vector.broadcast %99 : vector<8x1xf32> to vector<8x8xf32>
    %104 = arith.mulf %102, %103 : vector<8x8xf32>
    %105 = arith.truncf %104 : vector<8x8xf32> to vector<8x8xbf16>
    %c1_72 = arith.constant 1 : index
    %c0_73 = arith.constant 0 : index
    %c0_74 = arith.constant 0 : index
    %106 = vector.load %arg13[%c1_72, %c0_73, %c0_74] : memref<4x8x32xbf16, #tpu.memory_space<vmem>>, vector<1x8x32xbf16>
    %107 = vector.shape_cast %106 : vector<1x8x32xbf16> to vector<8x32xbf16>
    %cst_75 = arith.constant dense<0.000000e+00> : vector<8x32xf32>
    %108 = tpu.matmul %105, %107, %cst_75 {dimension_numbers = #tpu.dot_dimension_numbers<[1], [0], [0], [1], [0, 0, 1, 1], [], []>} : vector<8x8xbf16>, vector<8x32xbf16>, vector<8x32xf32> -> vector<8x32xf32>
    %109 = arith.addf %64, %108 : vector<8x32xf32>
    %c2 = arith.constant 2 : index
    %c0_76 = arith.constant 0 : index
    %c0_77 = arith.constant 0 : index
    %110 = vector.load %arg7[%c2, %c0_76, %c0_77] : memref<4x32x8xbf16, #tpu.memory_space<vmem>>, vector<1x32x8xbf16>
    %111 = vector.shape_cast %110 : vector<1x32x8xbf16> to vector<32x8xbf16>
    %cst_78 = arith.constant dense<0.000000e+00> : vector<8x8xf32>
    %112 = tpu.matmul %1, %111, %cst_78 {dimension_numbers = #tpu.dot_dimension_numbers<[1], [0], [0], [1], [0, 0, 1, 1], [], []>} : vector<8x32xbf16>, vector<32x8xbf16>, vector<8x8xf32> -> vector<8x8xf32>
    %c2_79 = arith.constant 2 : index
    %c0_80 = arith.constant 0 : index
    %c0_81 = arith.constant 0 : index
    %113 = vector.load %arg8[%c2_79, %c0_80, %c0_81] : memref<4x1x8xf32, #tpu.memory_space<vmem>>, vector<1x1x8xf32>
    %114 = vector.shape_cast %113 : vector<1x1x8xf32> to vector<1x8xf32>
    %115 = vector.broadcast %114 : vector<1x8xf32> to vector<8x8xf32>
    %116 = arith.addf %112, %115 : vector<8x8xf32>
    %c2_82 = arith.constant 2 : index
    %c0_83 = arith.constant 0 : index
    %c0_84 = arith.constant 0 : index
    %117 = vector.load %arg9[%c2_82, %c0_83, %c0_84] : memref<4x32x8xbf16, #tpu.memory_space<vmem>>, vector<1x32x8xbf16>
    %118 = vector.shape_cast %117 : vector<1x32x8xbf16> to vector<32x8xbf16>
    %cst_85 = arith.constant dense<0.000000e+00> : vector<8x8xf32>
    %119 = tpu.matmul %3, %118, %cst_85 {dimension_numbers = #tpu.dot_dimension_numbers<[1], [0], [0], [1], [0, 0, 1, 1], [], []>} : vector<8x32xbf16>, vector<32x8xbf16>, vector<8x8xf32> -> vector<8x8xf32>
    %c2_86 = arith.constant 2 : index
    %c0_87 = arith.constant 0 : index
    %c0_88 = arith.constant 0 : index
    %120 = vector.load %arg10[%c2_86, %c0_87, %c0_88] : memref<4x1x8xf32, #tpu.memory_space<vmem>>, vector<1x1x8xf32>
    %121 = vector.shape_cast %120 : vector<1x1x8xf32> to vector<1x8xf32>
    %122 = vector.broadcast %121 : vector<1x8xf32> to vector<8x8xf32>
    %123 = arith.addf %119, %122 : vector<8x8xf32>
    %c2_89 = arith.constant 2 : index
    %c0_90 = arith.constant 0 : index
    %c0_91 = arith.constant 0 : index
    %124 = vector.load %arg11[%c2_89, %c0_90, %c0_91] : memref<4x32x8xbf16, #tpu.memory_space<vmem>>, vector<1x32x8xbf16>
    %125 = vector.shape_cast %124 : vector<1x32x8xbf16> to vector<32x8xbf16>
    %cst_92 = arith.constant dense<0.000000e+00> : vector<8x8xf32>
    %126 = tpu.matmul %5, %125, %cst_92 {dimension_numbers = #tpu.dot_dimension_numbers<[1], [0], [0], [1], [0, 0, 1, 1], [], []>} : vector<8x32xbf16>, vector<32x8xbf16>, vector<8x8xf32> -> vector<8x8xf32>
    %c2_93 = arith.constant 2 : index
    %c0_94 = arith.constant 0 : index
    %c0_95 = arith.constant 0 : index
    %127 = vector.load %arg12[%c2_93, %c0_94, %c0_95] : memref<4x1x8xf32, #tpu.memory_space<vmem>>, vector<1x1x8xf32>
    %128 = vector.shape_cast %127 : vector<1x1x8xf32> to vector<1x8xf32>
    %129 = vector.broadcast %128 : vector<1x8xf32> to vector<8x8xf32>
    %130 = arith.addf %126, %129 : vector<8x8xf32>
    %cst_96 = arith.constant 0.353553385 : f32
    %131 = vector.broadcast %cst_96 : f32 to vector<8x8xf32>
    %132 = arith.mulf %116, %131 : vector<8x8xf32>
    %133 = arith.truncf %132 : vector<8x8xf32> to vector<8x8xbf16>
    %134 = arith.truncf %123 : vector<8x8xf32> to vector<8x8xbf16>
    %cst_97 = arith.constant dense<0.000000e+00> : vector<8x8xf32>
    %135 = tpu.matmul %133, %134, %cst_97 {dimension_numbers = #tpu.dot_dimension_numbers<[1], [1], [0], [0], [0, 0, 1, 0], [], []>} : vector<8x8xbf16>, vector<8x8xbf16>, vector<8x8xf32> -> vector<8x8xf32>
    %136 = arith.addf %135, %18 : vector<8x8xf32>
    %cst_98 = arith.constant dense<0xFF800000> : vector<8xf32>
    %137 = vector.multi_reduction <maximumf>, %136, %cst_98 [1] : vector<8x8xf32> to vector<8xf32>
    %138 = vector.shape_cast %137 : vector<8xf32> to vector<8x1xf32>
    %139 = vector.broadcast %138 : vector<8x1xf32> to vector<8x8xf32>
    %140 = arith.subf %136, %139 : vector<8x8xf32>
    %141 = math.exp %140 : vector<8x8xf32>
    %cst_99 = arith.constant dense<0.000000e+00> : vector<8xf32>
    %142 = vector.multi_reduction <add>, %141, %cst_99 [1] : vector<8x8xf32> to vector<8xf32>
    %143 = vector.shape_cast %142 : vector<8xf32> to vector<8x1xf32>
    %144 = tpu.reciprocal %143 {approx = true} : vector<8x1xf32> -> vector<8x1xf32>
    %145 = arith.truncf %141 : vector<8x8xf32> to vector<8x8xbf16>
    %146 = arith.truncf %130 : vector<8x8xf32> to vector<8x8xbf16>
    %cst_100 = arith.constant dense<0.000000e+00> : vector<8x8xf32>
    %147 = tpu.matmul %145, %146, %cst_100 {dimension_numbers = #tpu.dot_dimension_numbers<[1], [0], [0], [1], [0, 0, 1, 1], [], []>} : vector<8x8xbf16>, vector<8x8xbf16>, vector<8x8xf32> -> vector<8x8xf32>
    %148 = vector.broadcast %144 : vector<8x1xf32> to vector<8x8xf32>
    %149 = arith.mulf %147, %148 : vector<8x8xf32>
    %150 = arith.truncf %149 : vector<8x8xf32> to vector<8x8xbf16>
    %c2_101 = arith.constant 2 : index
    %c0_102 = arith.constant 0 : index
    %c0_103 = arith.constant 0 : index
    %151 = vector.load %arg13[%c2_101, %c0_102, %c0_103] : memref<4x8x32xbf16, #tpu.memory_space<vmem>>, vector<1x8x32xbf16>
    %152 = vector.shape_cast %151 : vector<1x8x32xbf16> to vector<8x32xbf16>
    %cst_104 = arith.constant dense<0.000000e+00> : vector<8x32xf32>
    %153 = tpu.matmul %150, %152, %cst_104 {dimension_numbers = #tpu.dot_dimension_numbers<[1], [0], [0], [1], [0, 0, 1, 1], [], []>} : vector<8x8xbf16>, vector<8x32xbf16>, vector<8x32xf32> -> vector<8x32xf32>
    %154 = arith.addf %109, %153 : vector<8x32xf32>
    %c3 = arith.constant 3 : index
    %c0_105 = arith.constant 0 : index
    %c0_106 = arith.constant 0 : index
    %155 = vector.load %arg7[%c3, %c0_105, %c0_106] : memref<4x32x8xbf16, #tpu.memory_space<vmem>>, vector<1x32x8xbf16>
    %156 = vector.shape_cast %155 : vector<1x32x8xbf16> to vector<32x8xbf16>
    %cst_107 = arith.constant dense<0.000000e+00> : vector<8x8xf32>
    %157 = tpu.matmul %1, %156, %cst_107 {dimension_numbers = #tpu.dot_dimension_numbers<[1], [0], [0], [1], [0, 0, 1, 1], [], []>} : vector<8x32xbf16>, vector<32x8xbf16>, vector<8x8xf32> -> vector<8x8xf32>
    %c3_108 = arith.constant 3 : index
    %c0_109 = arith.constant 0 : index
    %c0_110 = arith.constant 0 : index
    %158 = vector.load %arg8[%c3_108, %c0_109, %c0_110] : memref<4x1x8xf32, #tpu.memory_space<vmem>>, vector<1x1x8xf32>
    %159 = vector.shape_cast %158 : vector<1x1x8xf32> to vector<1x8xf32>
    %160 = vector.broadcast %159 : vector<1x8xf32> to vector<8x8xf32>
    %161 = arith.addf %157, %160 : vector<8x8xf32>
    %c3_111 = arith.constant 3 : index
    %c0_112 = arith.constant 0 : index
    %c0_113 = arith.constant 0 : index
    %162 = vector.load %arg9[%c3_111, %c0_112, %c0_113] : memref<4x32x8xbf16, #tpu.memory_space<vmem>>, vector<1x32x8xbf16>
    %163 = vector.shape_cast %162 : vector<1x32x8xbf16> to vector<32x8xbf16>
    %cst_114 = arith.constant dense<0.000000e+00> : vector<8x8xf32>
    %164 = tpu.matmul %3, %163, %cst_114 {dimension_numbers = #tpu.dot_dimension_numbers<[1], [0], [0], [1], [0, 0, 1, 1], [], []>} : vector<8x32xbf16>, vector<32x8xbf16>, vector<8x8xf32> -> vector<8x8xf32>
    %c3_115 = arith.constant 3 : index
    %c0_116 = arith.constant 0 : index
    %c0_117 = arith.constant 0 : index
    %165 = vector.load %arg10[%c3_115, %c0_116, %c0_117] : memref<4x1x8xf32, #tpu.memory_space<vmem>>, vector<1x1x8xf32>
    %166 = vector.shape_cast %165 : vector<1x1x8xf32> to vector<1x8xf32>
    %167 = vector.broadcast %166 : vector<1x8xf32> to vector<8x8xf32>
    %168 = arith.addf %164, %167 : vector<8x8xf32>
    %c3_118 = arith.constant 3 : index
    %c0_119 = arith.constant 0 : index
    %c0_120 = arith.constant 0 : index
    %169 = vector.load %arg11[%c3_118, %c0_119, %c0_120] : memref<4x32x8xbf16, #tpu.memory_space<vmem>>, vector<1x32x8xbf16>
    %170 = vector.shape_cast %169 : vector<1x32x8xbf16> to vector<32x8xbf16>
    %cst_121 = arith.constant dense<0.000000e+00> : vector<8x8xf32>
    %171 = tpu.matmul %5, %170, %cst_121 {dimension_numbers = #tpu.dot_dimension_numbers<[1], [0], [0], [1], [0, 0, 1, 1], [], []>} : vector<8x32xbf16>, vector<32x8xbf16>, vector<8x8xf32> -> vector<8x8xf32>
    %c3_122 = arith.constant 3 : index
    %c0_123 = arith.constant 0 : index
    %c0_124 = arith.constant 0 : index
    %172 = vector.load %arg12[%c3_122, %c0_123, %c0_124] : memref<4x1x8xf32, #tpu.memory_space<vmem>>, vector<1x1x8xf32>
    %173 = vector.shape_cast %172 : vector<1x1x8xf32> to vector<1x8xf32>
    %174 = vector.broadcast %173 : vector<1x8xf32> to vector<8x8xf32>
    %175 = arith.addf %171, %174 : vector<8x8xf32>
    %cst_125 = arith.constant 0.353553385 : f32
    %176 = vector.broadcast %cst_125 : f32 to vector<8x8xf32>
    %177 = arith.mulf %161, %176 : vector<8x8xf32>
    %178 = arith.truncf %177 : vector<8x8xf32> to vector<8x8xbf16>
    %179 = arith.truncf %168 : vector<8x8xf32> to vector<8x8xbf16>
    %cst_126 = arith.constant dense<0.000000e+00> : vector<8x8xf32>
    %180 = tpu.matmul %178, %179, %cst_126 {dimension_numbers = #tpu.dot_dimension_numbers<[1], [1], [0], [0], [0, 0, 1, 0], [], []>} : vector<8x8xbf16>, vector<8x8xbf16>, vector<8x8xf32> -> vector<8x8xf32>
    %181 = arith.addf %180, %18 : vector<8x8xf32>
    %cst_127 = arith.constant dense<0xFF800000> : vector<8xf32>
    %182 = vector.multi_reduction <maximumf>, %181, %cst_127 [1] : vector<8x8xf32> to vector<8xf32>
    %183 = vector.shape_cast %182 : vector<8xf32> to vector<8x1xf32>
    %184 = vector.broadcast %183 : vector<8x1xf32> to vector<8x8xf32>
    %185 = arith.subf %181, %184 : vector<8x8xf32>
    %186 = math.exp %185 : vector<8x8xf32>
    %cst_128 = arith.constant dense<0.000000e+00> : vector<8xf32>
    %187 = vector.multi_reduction <add>, %186, %cst_128 [1] : vector<8x8xf32> to vector<8xf32>
    %188 = vector.shape_cast %187 : vector<8xf32> to vector<8x1xf32>
    %189 = tpu.reciprocal %188 {approx = true} : vector<8x1xf32> -> vector<8x1xf32>
    %190 = arith.truncf %186 : vector<8x8xf32> to vector<8x8xbf16>
    %191 = arith.truncf %175 : vector<8x8xf32> to vector<8x8xbf16>
    %cst_129 = arith.constant dense<0.000000e+00> : vector<8x8xf32>
    %192 = tpu.matmul %190, %191, %cst_129 {dimension_numbers = #tpu.dot_dimension_numbers<[1], [0], [0], [1], [0, 0, 1, 1], [], []>} : vector<8x8xbf16>, vector<8x8xbf16>, vector<8x8xf32> -> vector<8x8xf32>
    %193 = vector.broadcast %189 : vector<8x1xf32> to vector<8x8xf32>
    %194 = arith.mulf %192, %193 : vector<8x8xf32>
    %195 = arith.truncf %194 : vector<8x8xf32> to vector<8x8xbf16>
    %c3_130 = arith.constant 3 : index
    %c0_131 = arith.constant 0 : index
    %c0_132 = arith.constant 0 : index
    %196 = vector.load %arg13[%c3_130, %c0_131, %c0_132] : memref<4x8x32xbf16, #tpu.memory_space<vmem>>, vector<1x8x32xbf16>
    %197 = vector.shape_cast %196 : vector<1x8x32xbf16> to vector<8x32xbf16>
    %cst_133 = arith.constant dense<0.000000e+00> : vector<8x32xf32>
    %198 = tpu.matmul %195, %197, %cst_133 {dimension_numbers = #tpu.dot_dimension_numbers<[1], [0], [0], [1], [0, 0, 1, 1], [], []>} : vector<8x8xbf16>, vector<8x32xbf16>, vector<8x32xf32> -> vector<8x32xf32>
    %199 = arith.addf %154, %198 : vector<8x32xf32>
    %c0_134 = arith.constant 0 : index
    %c0_135 = arith.constant 0 : index
    %200 = vector.load %arg14[%c0_134, %c0_135] : memref<1x32xf32, #tpu.memory_space<vmem>>, vector<1x32xf32>
    %201 = vector.broadcast %200 : vector<1x32xf32> to vector<8x32xf32>
    %202 = arith.addf %199, %201 : vector<8x32xf32>
    %c0_136 = arith.constant 0 : index
    %c0_137 = arith.constant 0 : index
    %c0_138 = arith.constant 0 : index
    %203 = vector.load %arg15[%c0_136, %c0_137, %c0_138] : memref<1x8x32xf32, #tpu.memory_space<vmem>>, vector<1x8x32xf32>
    %204 = vector.shape_cast %203 : vector<1x8x32xf32> to vector<8x32xf32>
    %205 = vector.shape_cast %202 : vector<8x32xf32> to vector<1x8x32xf32>
    tpu.vector_store %arg15[%c0_136, %c0_137, %c0_138], %205 {strides = array<i32>} : memref<1x8x32xf32, #tpu.memory_space<vmem>>, vector<1x8x32xf32>,
    return
  }
  func.func @transform_0(%arg0: i32, %arg1: i32) -> (i32, i32, i32) {
    %c0_i32 = arith.constant 0 : i32
    %c0_i32_0 = arith.constant 0 : i32
    return %arg0, %arg1, %c0_i32 : i32, i32, i32
  }
  func.func @transform_1(%arg0: i32, %arg1: i32) -> (i32, i32, i32) {
    %c0_i32 = arith.constant 0 : i32
    %c0_i32_0 = arith.constant 0 : i32
    %c0_i32_1 = arith.constant 0 : i32
    return %arg0, %c0_i32, %c0_i32_0 : i32, i32, i32
  }
  func.func @transform_2(%arg0: i32, %arg1: i32) -> (i32, i32, i32) {
    %c0_i32 = arith.constant 0 : i32
    %c0_i32_0 = arith.constant 0 : i32
    %c0_i32_1 = arith.constant 0 : i32
    return %arg0, %c0_i32, %c0_i32_0 : i32, i32, i32
  }
  func.func @transform_3(%arg0: i32, %arg1: i32) -> (i32, i32, i32) {
    %c0_i32 = arith.constant 0 : i32
    %c0_i32_0 = arith.constant 0 : i32
    %c0_i32_1 = arith.constant 0 : i32
    return %arg0, %c0_i32, %c0_i32_0 : i32, i32, i32
  }
  func.func @transform_4(%arg0: i32, %arg1: i32) -> (i32, i32, i32) {
    %c0_i32 = arith.constant 0 : i32
    %c0_i32_0 = arith.constant 0 : i32
    %c0_i32_1 = arith.constant 0 : i32
    return %c0_i32, %arg1, %c0_i32_0 : i32, i32, i32
  }
  func.func @transform_5(%arg0: i32, %arg1: i32) -> (i32, i32, i32) {
    %c0_i32 = arith.constant 0 : i32
    %c0_i32_0 = arith.constant 0 : i32
    %c0_i32_1 = arith.constant 0 : i32
    %c0_i32_2 = arith.constant 0 : i32
    return %c0_i32, %c0_i32_0, %c0_i32_1 : i32, i32, i32
  }
  func.func @transform_6(%arg0: i32, %arg1: i32) -> (i32, i32, i32) {
    %c0_i32 = arith.constant 0 : i32
    %c0_i32_0 = arith.constant 0 : i32
    %c0_i32_1 = arith.constant 0 : i32
    %c0_i32_2 = arith.constant 0 : i32
    return %c0_i32, %c0_i32_0, %c0_i32_1 : i32, i32, i32
  }
  func.func @transform_7(%arg0: i32, %arg1: i32) -> (i32, i32, i32) {
    %c0_i32 = arith.constant 0 : i32
    %c0_i32_0 = arith.constant 0 : i32
    %c0_i32_1 = arith.constant 0 : i32
    %c0_i32_2 = arith.constant 0 : i32
    return %c0_i32, %c0_i32_0, %c0_i32_1 : i32, i32, i32
  }
  func.func @transform_8(%arg0: i32, %arg1: i32) -> (i32, i32, i32) {
    %c0_i32 = arith.constant 0 : i32
    %c0_i32_0 = arith.constant 0 : i32
    %c0_i32_1 = arith.constant 0 : i32
    %c0_i32_2 = arith.constant 0 : i32
    return %c0_i32, %c0_i32_0, %c0_i32_1 : i32, i32, i32
  }
  func.func @transform_9(%arg0: i32, %arg1: i32) -> (i32, i32, i32) {
    %c0_i32 = arith.constant 0 : i32
    %c0_i32_0 = arith.constant 0 : i32
    %c0_i32_1 = arith.constant 0 : i32
    %c0_i32_2 = arith.constant 0 : i32
    return %c0_i32, %c0_i32_0, %c0_i32_1 : i32, i32, i32
  }
  func.func @transform_10(%arg0: i32, %arg1: i32) -> (i32, i32, i32) {
    %c0_i32 = arith.constant 0 : i32
    %c0_i32_0 = arith.constant 0 : i32
    %c0_i32_1 = arith.constant 0 : i32
    %c0_i32_2 = arith.constant 0 : i32
    return %c0_i32, %c0_i32_0, %c0_i32_1 : i32, i32, i32
  }
  func.func @transform_11(%arg0: i32, %arg1: i32) -> (i32, i32, i32) {
    %c0_i32 = arith.constant 0 : i32
    %c0_i32_0 = arith.constant 0 : i32
    %c0_i32_1 = arith.constant 0 : i32
    %c0_i32_2 = arith.constant 0 : i32
    return %c0_i32, %c0_i32_0, %c0_i32_1 : i32, i32, i32
  }
  func.func @transform_12(%arg0: i32, %arg1: i32) -> (i32, i32) {
    %c0_i32 = arith.constant 0 : i32
    %c0_i32_0 = arith.constant 0 : i32
    %c0_i32_1 = arith.constant 0 : i32
    return %c0_i32, %c0_i32_0 : i32, i32
  }
  func.func @transform_13(%arg0: i32, %arg1: i32) -> (i32, i32, i32) {
    %c0_i32 = arith.constant 0 : i32
    %c0_i32_0 = arith.constant 0 : i32
    return %arg0, %arg1, %c0_i32 : i32, i32, i32
  }
}

</mosaic_0001>

<bundles_post_ra>
// kernel: tpu_custom_call.1
= control target key start
LH: loop header
LB: loop body
LE: loop exit
PB: predicated region body
PF: predicated region fallthrough
CT: control target
= control target key end

     0   :  { %s2167_s0 = inlined_call_operand.vmem [shape: bf16[2,8,32], index: 0, kind: input, shape index: {}]   ;;  %s2168_s1 = inlined_call_operand.vmem [shape: bf16[2,8,32], index: 1, kind: input, shape index: {}]   ;;  %s2169_s2 = inlined_call_operand.vmem [shape: bf16[2,8,32], index: 2, kind: input, shape index: {}]   ;;  %s2170_s3 = inlined_call_operand.vmem [shape: s32[2,1,8], index: 3, kind: input, shape index: {}]   ;;  %s2171_s4 = inlined_call_operand.vmem [shape: s32[1,8,8], index: 4, kind: input, shape index: {}]   ;;  %s2172_s5 = inlined_call_operand.vmem [shape: bf16[4,32,8], index: 5, kind: input, shape index: {}]   ;;  %s2173_s6 = inlined_call_operand.vmem [shape: f32[4,1,8], index: 6, kind: input, shape index: {}]   ;;  %s2174_s7 = inlined_call_operand.vmem [shape: bf16[4,32,8], index: 7, kind: input, shape index: {}]   ;;  %s2175_s8 = inlined_call_operand.vmem [shape: f32[4,1,8], index: 8, kind: input, shape index: {}]   ;;  %s2176_s9 = inlined_call_operand.vmem [shape: bf16[4,32,8], index: 9, kind: input, shape index: {}]   ;;  %s2177_s10 = inlined_call_operand.vmem [shape: f32[4,1,8], index: 10, kind: input, shape index: {}]   ;;  %s2178_s11 = inlined_call_operand.vmem [shape: bf16[4,8,32], index: 11, kind: input, shape index: {}]   ;;  %s2179_s12 = inlined_call_operand.vmem [shape: f32[1,32], index: 12, kind: input, shape index: {}]   ;;  %s2180_s13 = inlined_call_operand.hbm [shape: f32[2,8,32], index: 13, kind: output, shape index: {}]  }
   0x1   :  { %2184 = sst [smem:[#allocation9_spill]] %s2167_s0 }
   0x2   :  { %18 = vsyncpa [#allocation3], 0 }
   0x3   :  { %20 = vsyncpa [#allocation3 + $0x1], 0  ;;  %s1856_s25 = smov 0   ;;  %s1858_s26 = smov 0  }
   0x4   :  { %s1860_s27 = smov 0   ;;  %s1862_s28 = smov 0  }
   0x5   :  { %s1864_s29 = smov 0   ;;  %s1866_s30 = smov 0  }
   0x6 LB: > { %2185 = sst [smem:[#allocation5_spill]] %s1770_s27  ;;  %s1412_s14 = sadd.s32 4294967295, %s1782_s30   ;;  %s1782_s30 = sphi %s1866_s30, %s26_s30   ;;  %s1778_s29 = sphi %s1864_s29, %s2195_s29   ;;  %s1774_s28 = sphi %s1862_s28, %s2194_s28   ;;  %s1770_s27 = sphi %s1860_s27, %s2193_s27   ;;  %s1766_s26 = sphi %s1858_s26, %s2197_s26   ;;  %s1762_s25 = sphi %s1856_s25, %s2196_s25  }
   0x7   : > { %2186 = sst [smem:[#allocation6_spill]] %s1778_s29  ;;  %s1413_s15 = sadd.s32 4294967294, %s1782_s30  }
   0x8   : > { %s38_s16 = sadd.s32 1, %s1778_s29  ;;  %s347_s17 = sadd.s32 1, %s1770_s27 }
   0x9   : > { %p40_p0 = scmp.ge.s32.totalorder %s38_s16, 2  ;;  %p357_p1 = scmp.ne.s32.totalorder %s1770_s27, %s1766_s26 }
   0xa   : > { %p358_p2 = scmp.eq.s32.totalorder %s1412_s14, 1  ;;  %p363_p3 = scmp.ne.s32.totalorder %s1766_s26, %s1762_s25 }
   0xb   : > { %s2199_s16 = smov (%p40_p0, %s38_s16), 0  ;;  %p364_p5 = scmp.eq.s32.totalorder %s1413_s15, 1 }
   0xc   : > { %2187 = sst [smem:[#allocation7_spill]] %s2199_s16  ;;  %p1896_p4 = por %p358_p2, %p357_p1 }
   0xd   : > { %s342_s19 = ssub.s32 %s1778_s29, %s2199_s16  ;;  %p1417_p6 = scmp.ge.s32.totalorder %s1782_s30, 1 }
   0xe   : > { %p345_p7 = scmp.eq.s32.totalorder %s342_s19, 0  ;;  %p1903_p8 = por %p364_p5, %p363_p3 }
   0xf   : > { %p443_p9 = scmp.lt.s32.totalorder %s1782_s30, 3 }
  0x10   : > { %s1909_s21 = scalar_select %p345_p7, %s1770_s27, %s347_s17  }
  0x11   : > { %p444_p10 = pnand %p1417_p6, %p443_p9 }
  0x12   : > { %2190 = sst [smem:[#allocation8_spill]] %s1909_s21  ;;  %p504_p11 = scmp.lt.s32.totalorder (!%p444_p10), %s1774_s28, 1 }
  0x13   : > { %447 = sbr.rel (%p444_p10) target bundleno = 1807 (0x70f), region = 72  ;;  %s2191_s0 = sld [smem:[#allocation9_spill]] (!%p444_p10) }
  0x14   : > { %s1591_s19 = sshll.u32 (!%p444_p10), %s1774_s28, 3 }
  0x18   : > { %v1595_v0 = vld [vmem:[%s2172_s5 + $0x8] sm:$0xff]  ;;  %v1594_v2 = vld [vmem:[%s2172_s5] sm:$0xff]  ;;  %s1925_s29 = scalar_select %p504_p11, %s1774_s28, 1  ;;  %vm559_vm0 = vcmask 261120   ;;  %v1603_v8 = vld [vmem:[%s2174_s7 + $0x18] sm:$0xff]  ;;  %vm651_vm1 = vcmask 64512  }
  0x19   : > { %v1597_v1 = vld [vmem:[%s2174_s7 + $0x8] sm:$0xff]  ;;  %569 = vmatpush.bf16.msra.mxu0 %v1595_v0  ;;  %v1596_v3 = vld [vmem:[%s2174_s7] sm:$0xff]  ;;  %v1602_v10 = vld [vmem:[%s2174_s7 + $0x10] sm:$0xff]  ;;  %v1784_v27 = vmov 0   ;;  %v1785_v32 = vmov 0.0   ;;  %vm686_vm6 = vcmask 1043456  }
  0x1a   : > { %605 = vmatpush.bf16.msra.mxu1 %v1597_v1  ;;  %s1419_s22 = sshll.u32 %s1925_s29, 2  ;;  %v1599_v6 = vld [vmem:[%s2176_s9 + $0x8] sm:$0xff]  ;;  %v1598_v7 = vld [vmem:[%s2176_s9] sm:$0xff]  ;;  %v1601_v23 = vld [vmem:[%s2172_s5 + $0x18] sm:$0xff]  ;;  %s521_s16 = scalar_lea.vmem %s2170_s3, %s1925_s29 }
  0x1b   : > { %s510_s24 = scalar_lea.vmem %s2191_s0, %s1419_s22  ;;  %s514_s15 = scalar_lea.vmem %s2168_s1, %s1419_s22  ;;  %641 = vmatpush.bf16.msra.mxu2 %v1599_v6  ;;  %v1675_v11 = vld [vmem:[%s2173_s6] ss:$0 sm:$0xff]  ;;  %v1600_v24 = vld [vmem:[%s2172_s5 + $0x10] sm:$0xff]  ;;  %v1678_v41 = vld [vmem:[%s2175_s8 + $0x1] ss:$0 sm:$0xff] }
  0x1c   : > { %v1934_v4 = vld [vmem:[%s510_s24] sm:$0xf]  ;;  %s518_s24 = scalar_lea.vmem %s2169_s2, %s1419_s22  ;;  %v1605_v50 = vld [vmem:[%s2176_s9 + $0x18] sm:$0xff]  ;;  %v1604_v52 = vld [vmem:[%s2176_s9 + $0x10] sm:$0xff]  ;;  %s1288_s22 = scalar_lea.hbm %s2180_s13, %s1591_s19 }
  0x1d   : > { %570 = vmatpush.bf16.msra.mxu0 %v1594_v2  ;;  %v1936_v5 = vld [vmem:[%s514_s15] sm:$0xf]  ;;  %s501_s15 = sand.u32 1, %s1766_s26  }
  0x1e   : > { %606 = vmatpush.bf16.msra.mxu1 %v1596_v3  ;;  %v1954_v9 = vld [vmem:[%s518_s24] sm:$0xf]  ;;  %s1292_s24 = sshll.u32 %s1288_s22, 4  ;;  %s1277_s28 = scalar_lea.sflag [#allocation3], %s501_s15  ;;  %s1293_s24 = int_to_ptr.hbm [resolvable:$true] %s1292_s24 }
  0x1f   : > { %642 = vmatpush.bf16.msra.mxu2 %v1598_v7  ;;  %v1676_v12 = vld [vmem:[%s2175_s8] ss:$0 sm:$0xff]  ;;  %v1679_v58 = vld [vmem:[%s2173_s6 + $0x1] ss:$0 sm:$0xff]  ;;  %s1718_s14 = sshra.s32 %s1293_s24, 4  ;;  %s1719_s14 = int_to_ptr.hbm [resolvable:$true] %s1718_s14 }
  0x20   : > { %1430 = vmatmul.msk.bf16.vlgmr.msra.gmra.mxu0 %vm559_vm0, %v1934_v4  ;;  %v530_v26 = vld [vmem:[%s521_s16] sm:$0x1]  ;;  %v1680_v1 = vld [vmem:[%s2177_s10 + $0x1] ss:$0 sm:$0xff]  ;;  %s1418_s16 = sshll.u32 %s501_s15, 3  ;;  %s1720_s21 = scalar_lea.hbm %s1719_s14, 8 }
  0x21   : > { %1439 = vmatmul.msk.bf16.vlgmr.msra.gmra.mxu1 %vm559_vm0, %v1936_v5  ;;  %vm531_vm2 = vcmp.ne.s32.totalorder %v530_v26, 0  ;;  %v532_v31 = vld [vmem:[%s2171_s4] sm:$0xff]  ;;  %s503_s17 = scalar_lea.vmem [#allocation2], %s1418_s16  ;;  %p1721_p12 = scmp.ne.s32.totalorder %s1719_s14, %s1720_s21 }
  0x22   : > { %1448 = vmatmul.msk.bf16.vlgmr.msra.gmra.mxu2 %vm559_vm0, %v1954_v9  ;;  %734 = vmatpush.bf16.msrb.mxu1 %v1601_v23  ;;  %v534_v28 = vsel %vm531_vm2, 1, %v1784_v27  ;;  %vm533_vm3 = vcmp.ne.s32.totalorder %v532_v31, 0  ;;  %v1677_v38 = vld [vmem:[%s2177_s10] ss:$0 sm:$0xff]  ;;  %v1495_v31 = vld [vmem:[%s2178_s11 + $0x4] sm:$0xf]  ;;  %p1725_p1 = scmp.lt.s32.totalorder %s1719_s14, %s2180_s13 }
  0x23   : > { %769 = vmatpush.bf16.msrb.mxu2 %v1603_v8  ;;  %v535_v30 = vperm.slane %v534_v28, 0  ;;  %v705_v62 = vld [vmem:[%s2178_s11] sm:$0xf]  ;;  %s1290_s23 = sshll.u32 %s503_s17, 4  ;;  %p1722_p13 = pnand %p1721_p12, %p1896_p4  ;;  %s1291_s23 = int_to_ptr.vmem [resolvable:$true] %s1290_s23 }
  0x24   : > { %v891_v63 = vsel %vm686_vm6, %v705_v62, 0  ;;  %s1724_s16 = scalar_lea.hbm %s2180_s13, 16 }
  0x25   : > { %vm536_vm4 = vcmp.eq.s32.totalorder %v535_v30, 1  ;;  %p1723_p0 = pneg %p1722_p13  ;;  %p1726_p2 = scmp.lt.s32.totalorder %s1724_s16, %s1720_s21 }
  0x26   : > { %735 = vmatpush.bf16.msrb.mxu1 %v1600_v24  ;;  %vm537_vm5 = vmor %vm536_vm4, %vm533_vm3 }
  0x27   : > { %770 = vmatpush.bf16.msrb.mxu2 %v1602_v10  ;;  %v1986_v33 = vsel %vm537_vm5, -3.4028235e+38, %v1785_v32  ;;  %v872_v32 = vsel %vm686_vm6, %v1495_v31, 0  ;;  %p1727_p3 = por %p1726_p2, %p1725_p1 }
  0x29   : > { %p1728_p5 = pnand %p1727_p3, %p1723_p0 }
  0x2b   : > { %881 = vmatpush.bf16.msra.mxu2 %v872_v32 }
  0x31   : > { %1464 = vmatmul.msk.bf16.vlgmr.msrb.gmra.mxu1 %vm559_vm0, %v1934_v4 }
  0x32   : > { %1478 = vmatmul.msk.bf16.vlgmr.msrb.gmra.mxu2 %vm559_vm0, %v1936_v5 }
  0x9d   : > { %v572_v13 = vpop.f32.mrf.mxu0 }
  0x9e   : > { %v608_v14 = vpop.f32.mrf.mxu1  ;;  %v573_v15 = vadd.f32 %v1675_v11, %v572_v13 }
  0x9f   : > { %v609_v16 = vadd.f32 %v1676_v12, %v608_v14 }
  0xa0   : > { %v648_v18 = vmul.f32 0.35355338, %v573_v15 }
  0xa1   : > { %v650_v17 = vpack.c.bf16 %v609_v16, %v609_v16 }
  0xa2   : > { %v649_v22 = vpack.c.bf16 %v648_v18, %v648_v18 }
  0xa3   : > { %v656_v19 = vsel %vm651_vm1, %v650_v17, 0 }
  0xa4   : > { %665 = vmatpush.bf16.xpose.msra.mxu3 %v656_v19  ;;  %v1609_v19 = vld [vmem:[%s2174_s7 + $0x28] sm:$0xff] }
  0xa5   : > { %v574_v20 = vpop.f32.mrf.mxu0  ;;  %v644_v25 = vpop.f32.mrf.mxu2 }
  0xa6   : > { %v610_v21 = vpop.f32.mrf.mxu1  ;;  %v645_v39 = vadd.f32 %v1677_v38, %v644_v25  ;;  %v1607_v20 = vld [vmem:[%s2172_s5 + $0x28] sm:$0xff] }
  0xa7   : > { %v1608_v21 = vld [vmem:[%s2174_s7 + $0x20] sm:$0xff] }
  0xa8   : > { %v682_v40 = vpack.c.bf16 %v645_v39, %v645_v39 }
  0xaa   : > { %v688_v43 = vsel %vm686_vm6, %v682_v40, 0 }
  0xab   : > { %1449 = vmatmul.msk.bf16.vlgmr.msra.gmra.mxu3 %vm651_vm1, %v649_v22  ;;  %697 = vmatpush.bf16.msrb.mxu0 %v688_v43  ;;  %v1606_v22 = vld [vmem:[%s2172_s5 + $0x20] sm:$0xff] }
  0xac   : > { %804 = vmatpush.bf16.msrb.mxu3 %v1605_v50  ;;  %v1681_v43 = vld [vmem:[%s2175_s8 + $0x2] ss:$0 sm:$0xff] }
  0xad   : > { %v646_v29 = vpop.f32.mrf.mxu2 }
  0xae   : > { %v737_v48 = vpop.f32.mrf.mxu1 }
  0xaf   : > { %v738_v59 = vadd.f32 %v1679_v58, %v737_v48 }
  0xb0   : > { %805 = vmatpush.bf16.msrb.mxu3 %v1604_v52 }
  0xb1   : > { %v811_v60 = vmul.f32 0.35355338, %v738_v59 }
  0xb3   : > { %v812_v61 = vpack.c.bf16 %v811_v60, %v811_v60  ;;  %v1683_v60 = vld [vmem:[%s2177_s10 + $0x2] ss:$0 sm:$0xff] }
  0xb4   : > { %900 = vmatpush.bf16.msra.mxu3 %v891_v63 }
  0xb5   : > { %v772_v42 = vpop.f32.mrf.mxu2 }
  0xb6   : > { %v773_v44 = vadd.f32 %v1678_v41, %v772_v42  ;;  %v739_v49 = vpop.f32.mrf.mxu1 }
  0xb8   : > { %v813_v45 = vpack.c.bf16 %v773_v44, %v773_v44  ;;  %v1682_v44 = vld [vmem:[%s2173_s6 + $0x2] ss:$0 sm:$0xff] }
  0xba   : > { %v818_v46 = vsel %vm651_vm1, %v813_v45, 0 }
  0xbb   : > { %827 = vmatpush.bf16.xpose.msra.mxu0 %v818_v46  ;;  %1492 = vmatmul.msk.bf16.vlgmr.msrb.gmra.mxu3 %vm559_vm0, %v1954_v9 }
  0xbd   : > { %v774_v47 = vpop.f32.mrf.mxu2 }
 0x12e   : > { %v667_v34 = vpop.f32.mrf.mxu3 }
 0x12f   : > { %v668_v35 = vadd.f32 %v667_v34, %v1986_v33 }
 0x131   : > { %v671_v36 = vsel %vm651_vm1, %v668_v35, -inf }
 0x132   : > { %672 = vmax.xlane.f32.xlu0 %v671_v36 }
 0x136   : > { %v669_v37 = vpop.f32.mrf.mxu3 }
 0x137   : > { %v1611_v37 = vld [vmem:[%s2176_s9 + $0x28] sm:$0xff] }
 0x138   : > { %1004 = vmatpush.bf16.msrb.mxu2 %v1611_v37 }
 0x13e   : > { %v807_v2 = vpop.f32.mrf.mxu3 }
 0x13f   : > { %v808_v7 = vadd.f32 %v1680_v1, %v807_v2  ;;  %v1615_v1 = vld [vmem:[%s2174_s7 + $0x38] sm:$0xff] }
 0x141   : > { %v844_v10 = vpack.c.bf16 %v808_v7, %v808_v7  ;;  %v1612_v7 = vld [vmem:[%s2172_s5 + $0x30] sm:$0xff] }
 0x143   : > { %v849_v12 = vsel %vm686_vm6, %v844_v10, 0 }
 0x144   : > { %858 = vmatpush.bf16.msra.mxu1 %v849_v12 }
 0x146   : > { %v809_v13 = vpop.f32.mrf.mxu3 }
 0x148   : > { %969 = vmatpush.bf16.msrb.mxu1 %v1609_v19 }
 0x14c   : > { %970 = vmatpush.bf16.msrb.mxu1 %v1608_v21 }
 0x1a5   : > { %v673_v51 = vpop.xlane.xlu0 %672 }
 0x1a6   : > { %v674_v53 = vsub.f32 %v668_v35, %v673_v51 }
 0x1a8   : > { %v675_v54 = vmul.f32 1.442695, %v674_v53  ;;  %v1610_v53 = vld [vmem:[%s2176_s9 + $0x20] sm:$0xff] }
 0x1a9   : > { %1005 = vmatpush.bf16.msrb.mxu2 %v1610_v53 }
 0x1aa   : > { %1688 = vpow2.f32 %v675_v54 }
 0x1b0   : > { %v1689_v55 = vpop.eup %1688 }
 0x1b1   : > { %v677_v56 = vsel %vm651_vm1, %v1689_v55, 0.0  ;;  %v681_v57 = vpack.c.bf16 %v1689_v55, %v1689_v55 }
 0x1b2   : > { %678 = vadd.xlane.f32.xlu1 %v677_v56 }
 0x1b3   : > { %1450 = vmatmul.msk.bf16.vlgmr.msrb.gmra.mxu0 %vm651_vm1, %v681_v57 }
 0x1b4   : > { %934 = vmatpush.bf16.msrb.mxu0 %v1607_v20 }
 0x1b8   : > { %935 = vmatpush.bf16.msrb.mxu0 %v1606_v22 }
 0x1c3   : > { %1493 = vmatmul.msk.bf16.vlgmr.msra.gmra.mxu0 %vm651_vm1, %v812_v61 }
 0x1d3   : > { %1511 = vmatmul.msk.bf16.vlgmr.msrb.gmra.mxu0 %vm559_vm0, %v1934_v4 }
 0x225   : > { %v679_v0 = vpop.xlane.xlu1 %678 }
 0x226   : > { %1690 = vrcp.f32 %v679_v0 }
 0x22c   : > { %v1691_v3 = vpop.eup %1690 }
 0x230   : > { %v699_v6 = vpop.f32.mrf.mxu0 }
 0x231   : > { %v703_v8 = vmul.f32 %v1691_v3, %v699_v6  ;;  %v1614_v3 = vld [vmem:[%s2174_s7 + $0x30] sm:$0xff]  ;;  %v1613_v6 = vld [vmem:[%s2172_s5 + $0x38] sm:$0xff] }
 0x233   : > { %v704_v11 = vpack.c.bf16 %v703_v8, %v703_v8 }
 0x235   : > { %1497 = vmatmul.msk.bf16.vlgmr.msra.gmra.mxu3 %vm651_vm1, %v704_v11 }
 0x238   : > { %v701_v14 = vpop.f32.mrf.mxu0 }
 0x240   : > { %v829_v15 = vpop.f32.mrf.mxu0 }
 0x241   : > { %v830_v16 = vadd.f32 %v829_v15, %v1986_v33 }
 0x243   : > { %v833_v17 = vsel %vm651_vm1, %v830_v16, -inf }
 0x244   : > { %834 = vmax.xlane.f32.xlu0 %v833_v17 }
 0x248   : > { %v831_v18 = vpop.f32.mrf.mxu0 }
 0x250   : > { %v937_v34 = vpop.f32.mrf.mxu0 }
 0x251   : > { %v938_v47 = vadd.f32 %v1682_v44, %v937_v34 }
 0x253   : > { %v1011_v50 = vmul.f32 0.35355338, %v938_v47 }
 0x255   : > { %v1012_v52 = vpack.c.bf16 %v1011_v50, %v1011_v50 }
 0x258   : > { %v939_v35 = vpop.f32.mrf.mxu0 }
 0x2b7   : > { %v835_v23 = vpop.xlane.xlu0 %834 }
 0x2b8   : > { %v836_v24 = vsub.f32 %v830_v16, %v835_v23  ;;  %v2037_v25 = vpop.f32.mrf.mxu3  ;;  %v1617_v23 = vld [vmem:[%s2176_s9 + $0x38] sm:$0xff] }
 0x2ba   : > { %v837_v26 = vmul.f32 1.442695, %v836_v24 }
 0x2bc   : > { %1692 = vpow2.f32 %v837_v26 }
 0x2c0   : > { %v904_v27 = vpop.f32.mrf.mxu3 }
 0x2c2   : > { %v1693_v28 = vpop.eup %1692 }
 0x2c3   : > { %v843_v29 = vpack.c.bf16 %v1693_v28, %v1693_v28  ;;  %v839_v30 = vsel %vm651_vm1, %v1693_v28, 0.0 }
 0x2c4   : > { %840 = vadd.xlane.f32.xlu1 %v839_v30  ;;  %v1685_v30 = vld [vmem:[%s2173_s6 + $0x3] ss:$0 sm:$0xff] }
 0x2c5   : > { %1494 = vmatmul.msk.bf16.vlgmr.msra.gmra.mxu1 %vm651_vm1, %v843_v29 }
 0x2d5   : > { %1525 = vmatmul.msk.bf16.vlgmr.msrb.gmra.mxu1 %vm559_vm0, %v1936_v5 }
 0x337   : > { %v841_v36 = vpop.xlane.xlu1 %840 }
 0x338   : > { %1694 = vrcp.f32 %v841_v36  ;;  %v1616_v36 = vld [vmem:[%s2176_s9 + $0x30] sm:$0xff] }
 0x33e   : > { %v1695_v38 = vpop.eup %1694 }
 0x342   : > { %v860_v39 = vpop.f32.mrf.mxu1 }
 0x343   : > { %v864_v40 = vmul.f32 %v1695_v38, %v860_v39 }
 0x345   : > { %v865_v41 = vpack.c.bf16 %v864_v40, %v864_v40 }
 0x347   : > { %1496 = vmatmul.msk.bf16.vlgmr.msra.gmra.mxu2 %vm651_vm1, %v865_v41 }
 0x348   : > { %1116 = vmatpush.bf16.msra.mxu2 %v1613_v6 }
 0x34a   : > { %v862_v42 = vpop.f32.mrf.mxu1 }
 0x34c   : > { %1117 = vmatpush.bf16.msra.mxu2 %v1612_v7 }
 0x352   : > { %v972_v45 = vpop.f32.mrf.mxu1 }
 0x353   : > { %v973_v46 = vadd.f32 %v1681_v43, %v972_v45  ;;  %v1686_v45 = vld [vmem:[%s2177_s10 + $0x3] ss:$0 sm:$0xff] }
 0x355   : > { %v1013_v48 = vpack.c.bf16 %v973_v46, %v973_v46 }
 0x357   : > { %v1018_v49 = vsel %vm651_vm1, %v1013_v48, 0  ;;  %1539 = vmatmul.msk.bf16.vlgmr.msrb.gmra.mxu2 %vm559_vm0, %v1954_v9 }
 0x358   : > { %1027 = vmatpush.bf16.xpose.msrb.mxu3 %v1018_v49 }
 0x35a   : > { %v974_v51 = vpop.f32.mrf.mxu1 }
 0x35f   : > { %1540 = vmatmul.msk.bf16.vlgmr.msrb.gmra.mxu3 %vm651_vm1, %v1012_v52 }
 0x360   : > { %1151 = vmatpush.bf16.msra.mxu3 %v1615_v1 }
 0x364   : > { %1152 = vmatpush.bf16.msra.mxu3 %v1614_v3 }
 0x367   : > { %1557 = vmatmul.msk.bf16.vlgmr.msra.gmra.mxu2 %vm559_vm0, %v1934_v4  ;;  %v1684_v4 = vld [vmem:[%s2175_s8 + $0x3] ss:$0 sm:$0xff] }
 0x36f   : > { %1571 = vmatmul.msk.bf16.vlgmr.msra.gmra.mxu3 %vm559_vm0, %v1936_v5  ;;  %v1542_v5 = vld [vmem:[%s2178_s11 + $0x8] sm:$0xf] }
 0x370   : > { %v1072_v15 = vsel %vm686_vm6, %v1542_v5, 0 }
 0x371   : > { %1081 = vmatpush.bf16.msra.mxu1 %v1072_v15 }
 0x3ca   : > { %v2064_v54 = vpop.f32.mrf.mxu2 }
 0x3cb   : > { %v903_v37 = vadd.f32 %v2037_v25, %v2064_v54  ;;  %v1588_v54 = vld [vmem:[%s2178_s11 + $0xc] sm:$0xf] }
 0x3d2   : > { %v885_v55 = vpop.f32.mrf.mxu2 }
 0x3d3   : > { %v1254_v55 = vsel %vm686_vm6, %v1588_v54, 0 }
 0x3d4   : > { %1263 = vmatpush.bf16.msrb.mxu3 %v1254_v55 }
 0x3da   : > { %v1007_v61 = vpop.f32.mrf.mxu2 }
 0x3db   : > { %v1008_v62 = vadd.f32 %v1683_v60, %v1007_v61 }
 0x3dd   : > { %v1044_v63 = vpack.c.bf16 %v1008_v62, %v1008_v62  ;;  %v1687_v62 = vld [vmem:[%s2179_s12] ss:$0 sm:$0xff] }
 0x3df   : > { %v1049_v0 = vsel %vm686_vm6, %v1044_v63, 0 }
 0x3e0   : > { %1058 = vmatpush.bf16.msra.mxu0 %v1049_v0 }
 0x3e2   : > { %v1029_v56 = vpop.f32.mrf.mxu3  ;;  %v1009_v2 = vpop.f32.mrf.mxu2 }
 0x3e3   : > { %v1030_v57 = vadd.f32 %v1029_v56, %v1986_v33 }
 0x3e4   : > { %1186 = vmatpush.bf16.msrb.mxu0 %v1617_v23 }
 0x3e5   : > { %v1033_v58 = vsel %vm651_vm1, %v1030_v57, -inf }
 0x3e6   : > { %1034 = vmax.xlane.f32.xlu2 %v1033_v58 }
 0x3e8   : > { %1187 = vmatpush.bf16.msrb.mxu0 %v1616_v36 }
 0x3ea   : > { %v1031_v59 = vpop.f32.mrf.mxu3  ;;  %v1119_v18 = vpop.f32.mrf.mxu2 }
 0x3eb   : > { %v1120_v32 = vadd.f32 %v1685_v30, %v1119_v18 }
 0x3ed   : > { %v1193_v34 = vmul.f32 0.35355338, %v1120_v32 }
 0x3ef   : > { %v1194_v35 = vpack.c.bf16 %v1193_v34, %v1193_v34 }
 0x3f2   : > { %v1154_v16 = vpop.f32.mrf.mxu3  ;;  %v1121_v22 = vpop.f32.mrf.mxu2 }
 0x3f3   : > { %v1155_v17 = vadd.f32 %v1684_v4, %v1154_v16 }
 0x3f5   : > { %v1195_v19 = vpack.c.bf16 %v1155_v17, %v1155_v17 }
 0x3f7   : > { %v1200_v21 = vsel %vm651_vm1, %v1195_v19, 0 }
 0x3f8   : > { %1209 = vmatpush.bf16.xpose.msrb.mxu1 %v1200_v21 }
 0x3fa   : > { %v1156_v20 = vpop.f32.mrf.mxu3 }
 0x459   : > { %v1035_v8 = vpop.xlane.xlu2 %1034 }
 0x45a   : > { %v1036_v10 = vsub.f32 %v1030_v57, %v1035_v8 }
 0x45c   : > { %v1037_v11 = vmul.f32 1.442695, %v1036_v10 }
 0x45e   : > { %1696 = vpow2.f32 %v1037_v11 }
 0x464   : > { %v1697_v12 = vpop.eup %1696 }
 0x465   : > { %v1043_v13 = vpack.c.bf16 %v1697_v12, %v1697_v12  ;;  %v1039_v14 = vsel %vm651_vm1, %v1697_v12, 0.0 }
 0x466   : > { %1040 = vadd.xlane.f32.xlu2 %v1039_v14 }
 0x467   : > { %1541 = vmatmul.msk.bf16.vlgmr.msra.gmra.mxu0 %vm651_vm1, %v1043_v13 }
 0x477   : > { %1585 = vmatmul.msk.bf16.vlgmr.msrb.gmra.mxu0 %vm559_vm0, %v1954_v9 }
 0x4d9   : > { %v1041_v24 = vpop.xlane.xlu2 %1040 }
 0x4da   : > { %1698 = vrcp.f32 %v1041_v24 }
 0x4e0   : > { %v1699_v26 = vpop.eup %1698 }
 0x4e4   : > { %v1060_v27 = vpop.f32.mrf.mxu0 }
 0x4e5   : > { %v1064_v28 = vmul.f32 %v1699_v26, %v1060_v27 }
 0x4e7   : > { %v1065_v29 = vpack.c.bf16 %v1064_v28, %v1064_v28 }
 0x4e9   : > { %1543 = vmatmul.msk.bf16.vlgmr.msra.gmra.mxu1 %vm651_vm1, %v1065_v29 }
 0x4ec   : > { %v1062_v31 = vpop.f32.mrf.mxu0 }
 0x4f4   : > { %v1189_v46 = vpop.f32.mrf.mxu0 }
 0x4f5   : > { %v1190_v47 = vadd.f32 %v1686_v45, %v1189_v46 }
 0x4f7   : > { %v1226_v9 = vpack.c.bf16 %v1190_v47, %v1190_v47 }
 0x4f9   : > { %1586 = vmatmul.msk.bf16.vlgmr.msrb.gmra.mxu1 %vm651_vm1, %v1194_v35  ;;  %v1231_v48 = vsel %vm686_vm6, %v1226_v9, 0 }
 0x4fa   : > { %1240 = vmatpush.bf16.msrb.mxu2 %v1231_v48 }
 0x4fc   : > { %v1191_v25 = vpop.f32.mrf.mxu0 }
 0x566   : > { %v1083_v38 = vpop.f32.mrf.mxu1 }
 0x567   : > { %v1087_v39 = vadd.f32 %v1083_v38, %v903_v37 }
 0x56e   : > { %v1085_v40 = vpop.f32.mrf.mxu1 }
 0x576   : > { %v1211_v41 = vpop.f32.mrf.mxu1 }
 0x577   : > { %v1212_v42 = vadd.f32 %v1211_v41, %v1986_v33 }
 0x579   : > { %v1215_v43 = vsel %vm651_vm1, %v1212_v42, -inf }
 0x57a   : > { %1216 = vmax.xlane.f32.xlu0 %v1215_v43 }
 0x57e   : > { %v1213_v44 = vpop.f32.mrf.mxu1 }
 0x5ed   : > { %v1217_v49 = vpop.xlane.xlu0 %1216 }
 0x5ee   : > { %v1218_v50 = vsub.f32 %v1212_v42, %v1217_v49 }
 0x5f0   : > { %v1219_v51 = vmul.f32 1.442695, %v1218_v50 }
 0x5f2   : > { %1700 = vpow2.f32 %v1219_v51 }
 0x5f8   : > { %v1701_v33 = vpop.eup %1700 }
 0x5f9   : > { %v1225_v52 = vpack.c.bf16 %v1701_v33, %v1701_v33  ;;  %v1221_v53 = vsel %vm651_vm1, %v1701_v33, 0.0 }
 0x5fa   : > { %1222 = vadd.xlane.f32.xlu1 %v1221_v53 }
 0x5fb   : > { %1587 = vmatmul.msk.bf16.vlgmr.msrb.gmra.mxu2 %vm651_vm1, %v1225_v52 }
 0x66d   : > { %v1223_v56 = vpop.xlane.xlu1 %1222 }
 0x66e   : > { %1702 = vrcp.f32 %v1223_v56 }
 0x674   : > { %v1703_v57 = vpop.eup %1702 }
 0x67e   : > { %v1242_v58 = vpop.f32.mrf.mxu2 }
 0x67f   : > { %v1246_v59 = vmul.f32 %v1703_v57, %v1242_v58 }
 0x681   : > { %v1247_v60 = vpack.c.bf16 %v1246_v59, %v1246_v59 }
 0x683   : > { %1589 = vmatmul.msk.bf16.vlgmr.msrb.gmra.mxu3 %vm651_vm1, %v1247_v60 }
 0x686   : > { %v1244_v61 = vpop.f32.mrf.mxu2 }
 0x706   : > { %v1265_v63 = vpop.f32.mrf.mxu3 }
 0x707   : > { %v1269_v0 = vadd.f32 %v1265_v63, %v1087_v39 }
 0x709   : > { %v1274_v1 = vadd.f32 %v1687_v62, %v1269_v0 }
 0x70b   : > { %1275 = vst.msk [vmem:[%s503_s17] sm:$0xff] %vm559_vm0, %v1274_v1 }
 0x70c   : > { %1731 = shalt.err (!%p1728_p5)
}
 0x70d   : > { %1618 = dma.vmem_to_hbm [thread:$0]  (%p1896_p4), %s1291_s23, 128, %s1293_s24, %s1277_s28  }
 0x70e   : > { %v1267_v2 = vpop.f32.mrf.mxu3 }
 0x70f PF: > { %p1624_p6 = scmp.ge.s32.totalorder %s1782_s30, 2  ;;  %s1304_s15 = sand.u32 1, %s1762_s25  }
 0x710   : > { %s1305_s0 = scalar_lea.sflag [#allocation3], %s1304_s15 }
 0x711   : > { %p1621_p7 = pnand %p1624_p6, %p1903_p8 }
 0x713   : > { %p1622_p9 = pneg %p1621_p7 }
 0x715   : > { %1757 = dma.done.wait (%p1622_p9), %s1305_s0, 128  }
 0x716   : > { %1759 = vsyncadd (%p1622_p9), %s1305_s0, 4294967168  ;;  %s26_s30 = sadd.s32 1, %s1782_s30   ;;  %s2192_s17 = sld [smem:[#allocation5_spill]] }
 0x717   : > { %p23_p10 = scmp.ge.s32.totalorder %s26_s30, 4   ;;  %s2193_s27 = sld [smem:[#allocation8_spill]] }
 0x718   : > { %s2194_s28 = sld [smem:[#allocation6_spill]]  ;;  %s2196_s25 = smov %s1766_s26 }
 0x719   : > { %s2195_s29 = sld [smem:[#allocation7_spill]]  ;;  %25 = sbr.rel (!%p23_p10) target bundleno = 6 (0x6), region = 140 }
 0x71c   : > { %s2197_s26 = smov %s2192_s17 }
 0x71e   :  { %1311 = vsyncpa [#allocation3], 1 }
 0x71f   :  { %1313 = vsyncpa [#allocation3 + $0x1], 1 }

</bundles_post_ra>
